<compile_context>
chip_gen: v7x
topology: tpu7x:2x2x1
jax: 0.10.0
libtpu: 0.0.40
codegen_flags: <defaults>
</compile_context>

<pallas_src>
import jax
import jax.numpy as jnp
from jax.experimental import pallas as pl
from jax.experimental.pallas import tpu as pltpu


def value_mlp_kernel(x_ref, w1_ref, b1_ref, w2_ref, b2_ref, w3_ref, b3_ref, o_ref):
    # Cast the streamed f32 state tile to the MXU dtype (bf16 by default).
    # Casting in-kernel (cheap VPU op, hidden under the matmuls) keeps the HBM
    # copy of `state` in f32 and avoids an extra wrapper-side pass over it.
    x = x_ref[...].astype(w1_ref.dtype)

    # Layer 1: Linear(state_dim -> hidden) + ReLU (bf16 MXU matmul, f32 accum).
    h = jnp.dot(x, w1_ref[...], preferred_element_type=jnp.float32)
    h = jnp.maximum(h + b1_ref[...], 0.0)

    # Layer 2: Linear(hidden -> hidden) + ReLU (dominant FLOPs).
    h = jnp.dot(h.astype(w2_ref.dtype), w2_ref[...], preferred_element_type=jnp.float32)
    h = jnp.maximum(h + b2_ref[...], 0.0)
    # Bias/ReLU stay f32 so the kernel also runs on v5e (no bf16 VALU); on
    # v6e/v7x the VALU has slack under the MXU at these tile sizes.

    # Layer 3: Linear(hidden -> 1). An N=1 MXU matmul costs roughly as much as
    # a full N=H pass, so use a VPU multiply + XLU cross-lane reduction.
    v = jnp.sum(h * w3_ref[...], axis=-1, keepdims=True) + b3_ref[0, 0]

    # NOTE: lane-dense output reshape (tile_b//128, 128) intentionally omitted:
    # the ~tile_b/8 masked vst cycles hide under MXU time at tile_b>=4096, and
    # the sublane->lane relayout the reshape needs costs comparable XLU work.
    o_ref[...] = v.astype(o_ref.dtype)


def _round_up(x, m):
    return ((x + m - 1) // m) * m


def _round_down(x, m):
    return (x // m) * m


def value_function_forward(state, params, tile_b=4096, use_bf16=True):
    """state: (B, state_dim) float32 -> (B,) float32, matching ValueFunction.forward."""
    w1, b1, w2, b2, w3, b3 = params
    B, S = state.shape
    H = w1.shape[1]

    mxu_dtype = jnp.bfloat16 if use_bf16 else jnp.float32
    mxu_itemsize = jnp.dtype(mxu_dtype).itemsize
    # One-time tiny cast of the matmul weights (resident in VMEM across tiles).
    w1c = w1.astype(mxu_dtype)
    w2c = w2.astype(mxu_dtype)
    weight_bytes = (S * H + H * H) * mxu_itemsize + (3 * H + 1) * 4  # + b1,b2,w3,b3 (f32)

    # --- batch tile selection -------------------------------------------------
    # Multiple of 8 (sublane rule), no larger than the batch needs, and capped
    # so the per-tile VMEM working set fits every generation:
    #   ~3*tile_b*H*4   f32 h + bf16 copy + matmul staging
    #   +2*tile_b*S*4   double-buffered state tile
    #   +2*tile_b*4     double-buffered output tile
    tile_b = max(8, _round_up(int(tile_b), 8))
    tile_b = min(tile_b, _round_up(B, 8))
    per_row = 3 * H * 4 + 2 * S * 4 + 2 * 4
    vmem_budget = 20 * 1024 * 1024  # safe for v7x (64 MiB physical) with headroom
    max_tile = max(8, _round_down((vmem_budget - weight_bytes) // per_row, 8))
    tile_b = min(tile_b, max_tile)

    grid = (pl.cdiv(B, tile_b),)  # no jnp.pad copy; Pallas handles the partial last block

    # Raise the scoped VMEM limit (v5e default is 16 MiB); 32-48 MiB fits all
    # generations' physical VMEM.
    footprint = per_row * tile_b + weight_bytes
    vmem_limit = int(min(48 * 1024 * 1024, max(32 * 1024 * 1024, 2 * footprint)))

    # Weights/biases: full-array VMEM blocks with a constant index_map ->
    # DMA'd once, resident across all batch tiles.
    def const_spec(arr):
        return pl.BlockSpec(arr.shape, lambda i: (0,) * arr.ndim)

    in_specs = [
        pl.BlockSpec((tile_b, S), lambda i: (i, 0)),          # state: streamed per tile
        const_spec(w1c), const_spec(b1),
        const_spec(w2c), const_spec(b2),
        const_spec(w3),                                       # (1, H) row vector
        pl.BlockSpec(memory_space=pltpu.MemorySpace.SMEM),    # b3 scalar in SMEM
    ]
    out_spec = pl.BlockSpec((tile_b, 1), lambda i: (i, 0))

    cost = pl.CostEstimate(
        flops=2 * B * (S * H + H * H + H),
        transcendentals=0,
        bytes_accessed=B * S * 4 + B * 4 + weight_bytes,
    )

    # TODO(synk): on v7x, confirm via profile that both TensorCores pick up
    # batch tiles; if not, switch the batch axis to pltpu.CORE_PARALLEL (or an
    # explicit core_map) instead of the plain "parallel" annotation.
    out = pl.pallas_call(
        value_mlp_kernel,
        out_shape=jax.ShapeDtypeStruct((B, 1), jnp.float32),
        grid=grid,
        in_specs=in_specs,
        out_specs=out_spec,
        compiler_params=pltpu.CompilerParams(
            dimension_semantics=("parallel",),
            vmem_limit_bytes=vmem_limit,
        ),
        cost_estimate=cost,
    )(state, w1c, b1, w2c, b2, w3, b3)

    # Squeeze(-1) from the PyTorch module (pure glue).
    return out[:, 0]


def init_value_function_params(key, state_dim, hidden_dim=256):
    """Deterministic init mimicking PyTorch nn.Linear default (uniform +/- 1/sqrt(fan_in)).

    w1/w2 stored as (in, out); biases as (1, out); w3 stored as a (1, hidden)
    row vector for the in-kernel broadcast + lane reduction. All f32; the
    forward wrapper casts the matmul weights to bf16 when use_bf16=True.
    """
    def linear(k, fan_in, fan_out):
        kw, kb = jax.random.split(k)
        bound = 1.0 / jnp.sqrt(jnp.float32(fan_in))
        w = jax.random.uniform(kw, (fan_in, fan_out), jnp.float32, -bound, bound)
        b = jax.random.uniform(kb, (1, fan_out), jnp.float32, -bound, bound)
        return w, b

    k1, k2, k3 = jax.random.split(key, 3)
    w1, b1 = linear(k1, state_dim, hidden_dim)
    w2, b2 = linear(k2, hidden_dim, hidden_dim)
    w3, b3 = linear(k3, hidden_dim, 1)
    w3 = w3.T  # (1, hidden) row vector for the VPU layer-3 reduction
    return (w1, b1, w2, b2, w3, b3)


def value_function_ref(state, params):
    """Pure-JAX f32 reference for correctness checks."""
    w1, b1, w2, b2, w3, b3 = params
    h = jnp.maximum(state @ w1 + b1, 0.0)
    h = jnp.maximum(h @ w2 + b2, 0.0)
    return (h @ w3.T + b3)[:, 0]


if __name__ == "__main__":
    key = jax.random.PRNGKey(0)
    k_param, k_state = jax.random.split(key)

    # Small shapes consistent with HalfCheetah: state_dim=17, modest hidden width, small batch.
    batch, state_dim, hidden_dim = 8, 17, 32

    params = init_value_function_params(k_param, state_dim, hidden_dim)
    state = jax.random.normal(k_state, (batch, state_dim), jnp.float32)
    ref = value_function_ref(state, params)

    # Exact f32 MXU path: tight tolerance.
    out_f32 = jax.block_until_ready(value_function_forward(state, params, use_bf16=False))
    assert out_f32.shape == (batch,), out_f32.shape
    assert jnp.allclose(out_f32, ref, atol=1e-5, rtol=1e-5), (out_f32, ref)

    # Default fast path (bf16 MXU inputs, f32 accumulation): looser tolerance.
    out = jax.block_until_ready(value_function_forward(state, params))
    assert out.shape == (batch,), out.shape
    assert jnp.allclose(out, ref, atol=3e-2, rtol=3e-2), (out, ref)

    # Non-multiple-of-tile batch with a multi-tile grid: exercises the
    # no-padding partial-block path (3 tiles of 8 rows covering 19 rows).
    batch2 = 19
    state2 = jax.random.normal(jax.random.PRNGKey(3), (batch2, state_dim), jnp.float32)
    out2 = jax.block_until_ready(value_function_forward(state2, params, tile_b=8))
    ref2 = value_function_ref(state2, params)
    assert out2.shape == (batch2,), out2.shape
    assert jnp.allclose(out2, ref2, atol=3e-2, rtol=3e-2), (out2, ref2)

    print("KERNEL_OK")
</pallas_src>

<mosaic_0001>
module attributes {stable_mosaic.version = 11 : i64} {
  func.func @value_mlp_kernel(%arg0: i32, %arg1: memref<8x17xf32, #tpu.memory_space<vmem>>, %arg2: memref<17x32xf32, #tpu.memory_space<vmem>>, %arg3: memref<1x32xf32, #tpu.memory_space<vmem>>, %arg4: memref<32x32xf32, #tpu.memory_space<vmem>>, %arg5: memref<1x32xf32, #tpu.memory_space<vmem>>, %arg6: memref<1x32xf32, #tpu.memory_space<vmem>>, %arg7: memref<1x1xf32, #tpu.memory_space<smem>>, %arg8: memref<8x1xf32, #tpu.memory_space<vmem>>) attributes {dimension_semantics = [#tpu.dimension_semantics<parallel>], iteration_bounds = array<i64: 1>, scalar_prefetch = 0 : i64, scratch_operands = 0 : i64, tpu.core_type = #tpu.core_type<tc>, window_params = [{transform_indices = @transform_0, window_bounds = array<i64: 8, 17>}, {pipeline_mode = #tpu.pipeline_mode<synchronous>, transform_indices = @transform_1, window_bounds = array<i64: 17, 32>}, {pipeline_mode = #tpu.pipeline_mode<synchronous>, transform_indices = @transform_2, window_bounds = array<i64: 1, 32>}, {pipeline_mode = #tpu.pipeline_mode<synchronous>, transform_indices = @transform_3, window_bounds = array<i64: 32, 32>}, {pipeline_mode = #tpu.pipeline_mode<synchronous>, transform_indices = @transform_4, window_bounds = array<i64: 1, 32>}, {pipeline_mode = #tpu.pipeline_mode<synchronous>, transform_indices = @transform_5, window_bounds = array<i64: 1, 32>}, {transform_indices = @transform_6, window_bounds = array<i64: 1, 1>}, {transform_indices = @transform_7, window_bounds = array<i64: 8, 1>}]} {
    %c0 = arith.constant 0 : index
    %c0_0 = arith.constant 0 : index
    %0 = vector.load %arg1[%c0, %c0_0] : memref<8x17xf32, #tpu.memory_space<vmem>>, vector<8x17xf32>
    %c0_1 = arith.constant 0 : index
    %c0_2 = arith.constant 0 : index
    %1 = vector.load %arg2[%c0_1, %c0_2] : memref<17x32xf32, #tpu.memory_space<vmem>>, vector<17x32xf32>
    %cst = arith.constant dense<0.000000e+00> : vector<8x32xf32>
    %2 = tpu.matmul %0, %1, %cst {dimension_numbers = #tpu.dot_dimension_numbers<[1], [0], [0], [1], [0, 0, 1, 1], [], []>} : vector<8x17xf32>, vector<17x32xf32>, vector<8x32xf32> -> vector<8x32xf32>
    %c0_3 = arith.constant 0 : index
    %c0_4 = arith.constant 0 : index
    %3 = vector.load %arg3[%c0_3, %c0_4] : memref<1x32xf32, #tpu.memory_space<vmem>>, vector<1x32xf32>
    %4 = vector.broadcast %3 : vector<1x32xf32> to vector<8x32xf32>
    %5 = arith.addf %2, %4 : vector<8x32xf32>
    %cst_5 = arith.constant 0.000000e+00 : f32
    %6 = vector.broadcast %cst_5 : f32 to vector<8x32xf32>
    %7 = arith.maximumf %5, %6 : vector<8x32xf32>
    %c0_6 = arith.constant 0 : index
    %c0_7 = arith.constant 0 : index
    %8 = vector.load %arg4[%c0_6, %c0_7] : memref<32x32xf32, #tpu.memory_space<vmem>>, vector<32x32xf32>
    %cst_8 = arith.constant dense<0.000000e+00> : vector<8x32xf32>
    %9 = tpu.matmul %7, %8, %cst_8 {dimension_numbers = #tpu.dot_dimension_numbers<[1], [0], [0], [1], [0, 0, 1, 1], [], []>} : vector<8x32xf32>, vector<32x32xf32>, vector<8x32xf32> -> vector<8x32xf32>
    %c0_9 = arith.constant 0 : index
    %c0_10 = arith.constant 0 : index
    %10 = vector.load %arg5[%c0_9, %c0_10] : memref<1x32xf32, #tpu.memory_space<vmem>>, vector<1x32xf32>
    %11 = vector.broadcast %10 : vector<1x32xf32> to vector<8x32xf32>
    %12 = arith.addf %9, %11 : vector<8x32xf32>
    %cst_11 = arith.constant 0.000000e+00 : f32
    %13 = vector.broadcast %cst_11 : f32 to vector<8x32xf32>
    %14 = arith.maximumf %12, %13 : vector<8x32xf32>
    %c0_12 = arith.constant 0 : index
    %c0_13 = arith.constant 0 : index
    %15 = vector.load %arg6[%c0_12, %c0_13] : memref<1x32xf32, #tpu.memory_space<vmem>>, vector<1x32xf32>
    %16 = vector.broadcast %15 : vector<1x32xf32> to vector<8x32xf32>
    %17 = arith.mulf %14, %16 : vector<8x32xf32>
    %cst_14 = arith.constant dense<0.000000e+00> : vector<8xf32>
    %18 = vector.multi_reduction <add>, %17, %cst_14 [1] : vector<8x32xf32> to vector<8xf32>
    %19 = vector.shape_cast %18 : vector<8xf32> to vector<8x1xf32>
    %c0_15 = arith.constant 0 : index
    %c0_16 = arith.constant 0 : index
    %20 = memref.load %arg7[%c0_15, %c0_16] : memref<1x1xf32, #tpu.memory_space<smem>>
    %21 = vector.broadcast %20 : f32 to vector<8x1xf32>
    %22 = arith.addf %19, %21 : vector<8x1xf32>
    %c0_17 = arith.constant 0 : index
    %c0_18 = arith.constant 0 : index
    %23 = vector.load %arg8[%c0_17, %c0_18] : memref<8x1xf32, #tpu.memory_space<vmem>>, vector<8x1xf32>
    tpu.vector_store %arg8[%c0_17, %c0_18], %22 {strides = array<i32>} : memref<8x1xf32, #tpu.memory_space<vmem>>, vector<8x1xf32>,
    return
  }
  func.func @transform_0(%arg0: i32) -> (i32, i32) {
    %c0_i32 = arith.constant 0 : i32
    %c0_i32_0 = arith.constant 0 : i32
    return %arg0, %c0_i32 : i32, i32
  }
  func.func @transform_1(%arg0: i32) -> (i32, i32) {
    %c0_i32 = arith.constant 0 : i32
    %c0_i32_0 = arith.constant 0 : i32
    %c0_i32_1 = arith.constant 0 : i32
    return %c0_i32, %c0_i32_0 : i32, i32
  }
  func.func @transform_2(%arg0: i32) -> (i32, i32) {
    %c0_i32 = arith.constant 0 : i32
    %c0_i32_0 = arith.constant 0 : i32
    %c0_i32_1 = arith.constant 0 : i32
    return %c0_i32, %c0_i32_0 : i32, i32
  }
  func.func @transform_3(%arg0: i32) -> (i32, i32) {
    %c0_i32 = arith.constant 0 : i32
    %c0_i32_0 = arith.constant 0 : i32
    %c0_i32_1 = arith.constant 0 : i32
    return %c0_i32, %c0_i32_0 : i32, i32
  }
  func.func @transform_4(%arg0: i32) -> (i32, i32) {
    %c0_i32 = arith.constant 0 : i32
    %c0_i32_0 = arith.constant 0 : i32
    %c0_i32_1 = arith.constant 0 : i32
    return %c0_i32, %c0_i32_0 : i32, i32
  }
  func.func @transform_5(%arg0: i32) -> (i32, i32) {
    %c0_i32 = arith.constant 0 : i32
    %c0_i32_0 = arith.constant 0 : i32
    %c0_i32_1 = arith.constant 0 : i32
    return %c0_i32, %c0_i32_0 : i32, i32
  }
  func.func @transform_6(%arg0: i32) -> (i32, i32) {
    %c0_i32 = arith.constant 0 : i32
    %c0_i32_0 = arith.constant 0 : i32
    %c0_i32_1 = arith.constant 0 : i32
    return %c0_i32, %c0_i32_0 : i32, i32
  }
  func.func @transform_7(%arg0: i32) -> (i32, i32) {
    %c0_i32 = arith.constant 0 : i32
    %c0_i32_0 = arith.constant 0 : i32
    return %arg0, %c0_i32 : i32, i32
  }
}

</mosaic_0001>

<bundles_post_ra>
// kernel: tpu_custom_call.1
= control target key start
LH: loop header
LB: loop body
LE: loop exit
PB: predicated region body
PF: predicated region fallthrough
CT: control target
= control target key end

     0   :  { %13 = vsyncpa [#allocation4], 0  ;;  %s491_s0 = inlined_call_operand.hbm [shape: f32[8,17], index: 0, kind: input, shape index: {}]   ;;  %s492_s1 = inlined_call_operand.hbm [shape: f32[17,32], index: 1, kind: input, shape index: {}]   ;;  %s493_s2 = inlined_call_operand.vmem [shape: f32[1,32], index: 2, kind: input, shape index: {}]   ;;  %s494_s3 = inlined_call_operand.hbm [shape: f32[32,32], index: 3, kind: input, shape index: {}]   ;;  %s495_s4 = inlined_call_operand.vmem [shape: f32[1,32], index: 4, kind: input, shape index: {}]   ;;  %s496_s5 = inlined_call_operand.vmem [shape: f32[1,32], index: 5, kind: input, shape index: {}]   ;;  %s497_s6 = inlined_call_operand.<no memory space> [shape: f32[1,1], index: 6, kind: input, shape index: {}]   ;;  %s498_s7 = inlined_call_operand.vmem [shape: f32[8,1], index: 7, kind: output, shape index: {}]  }
   0x1   :  { %14 = vsyncpa [#allocation6], 0  ;;  %s386_s24 = smov [#allocation5]   ;;  %s316_s28 = scalar_lea.hbm %s492_s1, 384 }
   0x2   :  { %s30_s25 = sshll.u32 %s386_s24, 4  ;;  %p317_p0 = scmp.ne.s32.totalorder %s492_s1, %s316_s28  ;;  %s31_s25 = int_to_ptr.vmem [resolvable:$true] %s30_s25 }
   0x3   :  { %p320_p1 = scmp.lt.u32.totalorder %s316_s28, %s492_s1 }
   0x5   :  { %p322_p2 = pnand %p320_p1, %p317_p0 }
   0x7   :  { %325 = shalt.err (!%p322_p2)
}
   0x8   :  { %s326_s10 = scalar_lea.vmem %s31_s25, 384  ;;  %p331_p4 = scmp.lt.s32.totalorder %s31_s25, %s31_s25 }
   0x9   :  { %p327_p3 = scmp.ne.s32.totalorder %s31_s25, %s326_s10  ;;  %p332_p5 = scmp.lt.s32.totalorder %s326_s10, %s326_s10 }
   0xb   :  { %p333_p6 = por %p332_p5, %p331_p4 }
   0xd   :  { %p334_p7 = pnand %p333_p6, %p327_p3 }
   0xf   :  { %337 = shalt.err (!%p334_p7)
}
  0x10   :  { %s387_s11 = smov 128   ;;  %s388_s12 = smov 8  }
  0x11   :  { %36 = dma.hbm_to_vmem [thread:$0]  %s492_s1, 384, %s31_s25, [#allocation6], %s387_s11, %s387_s11, %s388_s12  }
  0x12   :  { %s389_s15 = smov [#allocation3]   ;;  %s390_s17 = smov [#allocation7]  }
  0x13   :  { %s21_s16 = sshll.u32 %s389_s15, 4  ;;  %s44_s18 = sshll.u32 %s390_s17, 4  ;;  %s22_s16 = int_to_ptr.vmem [resolvable:$true] %s21_s16  ;;  %s45_s18 = int_to_ptr.vmem [resolvable:$true] %s44_s18 }
  0x14   :  { %s338_s21 = scalar_lea.hbm %s491_s0, 128 }
  0x15   :  { %p339_p8 = scmp.ne.s32.totalorder %s491_s0, %s338_s21  ;;  %p342_p9 = scmp.lt.u32.totalorder %s338_s21, %s491_s0 }
  0x17   :  { %p344_p10 = pnand %p342_p9, %p339_p8 }
  0x19   :  { %347 = shalt.err (!%p344_p10)
}
  0x1a   :  { %s348_s1 = scalar_lea.vmem %s22_s16, 128  ;;  %p353_p12 = scmp.lt.s32.totalorder %s22_s16, %s22_s16 }
  0x1b   :  { %p349_p11 = scmp.ne.s32.totalorder %s22_s16, %s348_s1  ;;  %p354_p13 = scmp.lt.s32.totalorder %s348_s1, %s348_s1 }
  0x1d   :  { %p355_p0 = por %p354_p13, %p353_p12 }
  0x1f   :  { %p356_p1 = pnand %p355_p0, %p349_p11 }
  0x21   :  { %359 = shalt.err (!%p356_p1)
}
  0x22   :  { %24 = dma.hbm_to_vmem [thread:$0]  %s491_s0, 128, %s22_s16, [#allocation4]  }
  0x23   :  { %s360_s30 = scalar_lea.hbm %s494_s3, 512 }
  0x24   :  { %p361_p2 = scmp.ne.s32.totalorder %s494_s3, %s360_s30  ;;  %p364_p3 = scmp.lt.u32.totalorder %s360_s30, %s494_s3 }
  0x26   :  { %p366_p4 = pnand %p364_p3, %p361_p2 }
  0x28   :  { %369 = shalt.err (!%p366_p4)
}
  0x29   :  { %s370_s14 = scalar_lea.vmem %s45_s18, 512  ;;  %p375_p6 = scmp.lt.s32.totalorder %s45_s18, %s45_s18 }
  0x2a   :  { %p371_p5 = scmp.ne.s32.totalorder %s45_s18, %s370_s14  ;;  %p376_p7 = scmp.lt.s32.totalorder %s370_s14, %s370_s14 }
  0x2c   :  { %p377_p8 = por %p376_p7, %p375_p6 }
  0x2e   :  { %p378_p9 = pnand %p377_p8, %p371_p5 }
  0x30   :  { %381 = shalt.err (!%p378_p9)
}
  0x31   :  { %50 = dma.hbm_to_vmem [thread:$0]  %s494_s3, 512, %s45_s18, [#allocation6], %s387_s11, %s387_s11, %s388_s12  }
  0x32   :  { %382 = dma.done.wait [#allocation4], 128  }
  0x33   :  { %383 = vsyncadd [#allocation4], 4294967168 }
  0x34   :  { %384 = dma.done.wait [#allocation6], 896  }
  0x35   :  { %385 = vsyncadd [#allocation6], 4294966400  ;;  %v391_v0 = vmov 0.0|0.0   ;;  %vm392_vm0 = vmmov 0   ;;  %v393_v1 = vmov 0.0   ;;  %v67_v2 = vld [vmem:[#allocation5] sm:$0xff]  ;;  %v254_v26 = vstv %s497_s6 }
  0x36   :  { %299 = vmatprep.subr.bf16.mxu0 %v391_v0  ;;  %285 = vmatprep.mubr.msk.f32.mxu0 %vm392_vm0, %v393_v1  ;;  %v68_v3 = vld [vmem:[#allocation5 + $0x8] sm:$0xff]  ;;  %v156_v5 = vld [vmem:[#allocation7] sm:$0xff]  ;;  %v157_v6 = vld [vmem:[#allocation7 + $0x8] sm:$0xff]  ;;  %vm81_vm1 = vcmask 1040384   ;;  %vm77_vm2 = vcmask 138240   ;;  %vm167_vm3 = vcmask 261120  }
  0x37   :  { %302 = vmatprep.subr.bf16.mxu1 %v391_v0  ;;  %296 = vmatprep.mubr.msk.f32.mxu1 %vm392_vm0, %v393_v1  ;;  %v300_v4 = vpack.c.bf16 %v68_v3, %v67_v2  ;;  %v303_v7 = vpack.c.bf16 %v157_v6, %v156_v5  ;;  %v69_v8 = vld [vmem:[#allocation5 + $0x10] sm:$0x1]  ;;  %v66_v9 = vld [vmem:[#allocation3] sm:$0xff]  ;;  %v158_v10 = vld [vmem:[#allocation7 + $0x10] sm:$0xff]  ;;  %vm256_vm4 = vcmask 7168  }
  0x38   :  { %v159_v11 = vld [vmem:[#allocation7 + $0x18] sm:$0xff]  ;;  %v264_v13 = vld [vmem:[%s493_s2] ss:$0 sm:$0xff] }
  0x39   :  { %301 = vmatpush3.bf16.msra.mxu0 %v300_v4  ;;  %304 = vmatpush3.bf16.msra.mxu1 %v303_v7  ;;  %v306_v12 = vpack.c.bf16 %v159_v11, %v158_v10  ;;  %v267_v18 = vld [vmem:[%s495_s4] ss:$0 sm:$0xff] }
  0x3a   :  { %283 = vmatprep.subr.mxu0 %v393_v1  ;;  %305 = vmatprep.subr.bf16.mxu1 %v391_v0  ;;  %v269_v22 = vld [vmem:[%s496_s5] ss:$0 sm:$0xff] }
  0x3d   :  { %284 = vmatpush3.msk.msra.mxu0 %vm81_vm1, %v69_v8  ;;  %307 = vmatpush3.bf16.msra.mxu1 %v306_v12 }
  0x3e   :  { %286 = vmatmul.mubr.msk.f32.vlgmr.msra.gmra.mrb[0].mxu0 %vm77_vm2, %v66_v9 }
 0x111   :  { %v151_v14 = vpop.f32.mrb[0].mxu0 }
 0x112   :  { %v152_v15 = vadd.f32 %v264_v13, %v151_v14  ;;  %v287_v16 = vpop.f32.mrb[1].mxu0 }
 0x114   :  { %v155_v17 = vmax.f32 %v152_v15, 0.0 }
 0x116   :  { %297 = vmatmul.mubr.msk.f32.vlgmr.msra.gmra.mrb[0].mxu1 %vm167_vm3, %v155_v17 }
 0x1e9   :  { %v237_v19 = vpop.f32.mrb[0].mxu1 }
 0x1ea   :  { %v238_v20 = vadd.f32 %v267_v18, %v237_v19  ;;  %v298_v21 = vpop.f32.mrb[1].mxu1 }
 0x1ec   :  { %v241_v23 = vmax.f32 %v238_v20, 0.0 }
 0x1ee   :  { %v249_v24 = vmul.f32 %v269_v22, %v241_v23 }
 0x1f0   :  { %v250_v25 = vsel %vm167_vm3, %v249_v24, 0.0 }
 0x1f1   :  { %251 = vadd.xlane.f32.xlu0 %v250_v25 }
 0x27e   :  { %v252_v27 = vpop.xlane.xlu0 %251 }
 0x27f   :  { %v255_v28 = vadd.f32 %v254_v26, %v252_v27 }
 0x281   :  { %257 = vst.msk [vmem:[%s498_s7] sm:$0xff] %vm256_vm4, %v255_v28 }
 0x282   :  { %262 = vsyncpa [#allocation4], 1 }
 0x283   :  { %263 = vsyncpa [#allocation6], 1 }

</bundles_post_ra>
